<compile_context>
chip_gen: v6e
topology: v6e:2x2x1
jax: 0.10.0
libtpu: 0.0.40
codegen_flags: <defaults>
</compile_context>

<pallas_src>
import functools

import jax
import jax.numpy as jnp
from jax.experimental import pallas as pl
from jax.experimental.pallas import tpu as pltpu


def _round_up(x, m):
    return (x + m - 1) // m * m


def _tune_for_device():
    """(target_rows_per_step, vmem_limit_bytes, prefer_split_across_cores)."""
    try:
        kind = jax.devices()[0].device_kind.lower()
    except Exception:  # pragma: no cover - defensive
        kind = ""
    if "v5" in kind:
        return 512, 32 * 1024 * 1024, False      # 128x128 MXU, 16 MiB scoped default
    if "v7" in kind or "7x" in kind:
        return 1024, 48 * 1024 * 1024, True      # 64 MiB physical VMEM, 2 TCs/chip
    if "v6" in kind:
        return 2048, 64 * 1024 * 1024, False     # 128 MiB VMEM, amortize step overhead
    return 1024, 32 * 1024 * 1024, False


def _choose_batch_tile(batch, seq_pad, target_rows, prefer_split):
    """Pick batch tile TB. Multi-block tiles are 8-aligned (output sublanes)."""
    tb = max(1, -(-target_rows // seq_pad))
    if tb >= batch:
        tb = batch
    else:
        tb = _round_up(tb, 8)
        if tb >= batch:
            tb = batch
    # v7x: make sure the 'parallel' grid axis actually splits across 2 cores.
    if prefer_split and tb == batch and batch >= 16:
        half = _round_up((batch + 1) // 2, 8)
        if half < batch:
            tb = half
    b_pad = _round_up(batch, tb)
    return tb, b_pad


def _kimcnn_kernel(tok_ref, fused_ref, bi_ref, fw_ref, fb_ref, out_ref, *,
                   seq_pad, seq_valid):
    """Fused embedding-gather(+conv1+BN) + ReLU + avg-pool + fc heads.

    Per grid step (one batch tile of TB elements, R = TB * seq_pad rows):
      tok_ref   : (R, 1)          int32 token ids (flattened batch tile)
      fused_ref : (V_pad, F_pad)  bf16  embedding @ (conv1_w * bn_scale)
      bi_ref    : (1, F_pad)      f32   folded BN bias
      fw_ref    : (F_pad, O_pad)  bf16  concatenated fc heads, 1/S pre-folded
      fb_ref    : (1, O_pad)      f32   concatenated fc biases
      out_ref   : (TB, O_pad)     f32   concatenated logits (lane-dense)
    """
    r = tok_ref.shape[0]                       # TB * seq_pad (static)
    tb = r // seq_pad
    v_pad, f_pad = fused_ref.shape

    # Exact one-hot gather: (1, V_pad) iota broadcast vs (R, 1) ids, bool->bf16.
    tok = tok_ref[...]                                           # (R, 1) int32
    col = jax.lax.broadcasted_iota(jnp.int32, (1, v_pad), 1)     # (1, V_pad)
    one_hot = (col == tok).astype(fused_ref.dtype)               # (R, V_pad)

    # Embedding + conv1 (+BN scale) in a single MXU matmul, f32 accumulation.
    h = jnp.dot(one_hot, fused_ref[...],
                preferred_element_type=jnp.float32)              # (R, F_pad)
    h = jnp.maximum(h + bi_ref[...], 0.0)                        # BN bias + ReLU

    # Mask padded sequence rows (only emitted when S was padded to 8-alignment).
    if seq_pad != seq_valid:
        pos = jax.lax.broadcasted_iota(jnp.int32, (r, 1), 0) % seq_pad
        h = jnp.where(pos < seq_valid, h, 0.0)

    # AdaptiveAvgPool2d(1) + Flatten: sublane-aligned sum (1/S folded into fc_w).
    pooled = jnp.sum(h.reshape(tb, seq_pad, f_pad), axis=1)      # (TB, F_pad) f32

    # StaticTaskRouting heads, concatenated: (TB, F_pad) @ (F_pad, O_pad).
    logits = jnp.dot(pooled.astype(fw_ref.dtype), fw_ref[...],
                     preferred_element_type=jnp.float32)
    out_ref[...] = logits + fb_ref[...]


@functools.partial(jax.jit, static_argnames=("task_outputs",))
def kimcnn_pallas_forward(tokens, params, task_outputs):
    """tokens: int32 (B, S).  Returns tuple of per-task logits (f32)."""
    fused = params["fused_emb_conv"]   # (V_pad, F_pad) bf16
    bi = params["bn_bias"]             # (1, F_pad)  f32
    fw = params["fc_w"]                # (F_pad, O_pad) bf16, 1/S folded in
    fb = params["fc_b"]                # (1, O_pad)  f32
    o_total = sum(task_outputs)

    B, S = tokens.shape
    s_pad = _round_up(S, 8)            # keep the pool reshape sublane-aligned
    target_rows, vmem_limit, prefer_split = _tune_for_device()
    tb, b_pad = _choose_batch_tile(B, s_pad, target_rows, prefer_split)

    tok = tokens.astype(jnp.int32)
    if b_pad != B or s_pad != S:
        tok = jnp.pad(tok, ((0, b_pad - B), (0, s_pad - S)))
    tok2d = tok.reshape(b_pad * s_pad, 1)
    n_blocks = b_pad // tb
    rows = tb * s_pad

    v_pad, f_pad = fused.shape
    o_pad = fw.shape[1]

    kernel = functools.partial(_kimcnn_kernel, seq_pad=s_pad, seq_valid=S)

    out = pl.pallas_call(
        kernel,
        out_shape=jax.ShapeDtypeStruct((b_pad, o_pad), jnp.float32),
        grid_spec=pltpu.PrefetchScalarGridSpec(
            num_scalar_prefetch=0,
            grid=(n_blocks,),
            in_specs=[
                pl.BlockSpec((rows, 1), lambda b: (b, 0)),        # token ids
                pl.BlockSpec((v_pad, f_pad), lambda b: (0, 0)),   # fused table
                pl.BlockSpec((1, f_pad), lambda b: (0, 0)),       # BN bias
                pl.BlockSpec((f_pad, o_pad), lambda b: (0, 0)),   # fc weights
                pl.BlockSpec((1, o_pad), lambda b: (0, 0)),       # fc biases
            ],
            out_specs=pl.BlockSpec((tb, o_pad), lambda b: (b, 0)),
        ),
        compiler_params=pltpu.CompilerParams(
            dimension_semantics=("parallel",),
            vmem_limit_bytes=vmem_limit,
        ),
    )(tok2d, fused, bi, fw, fb)

    logits_all = out[:B, :o_total]             # strip batch / lane padding
    outs, off = [], 0
    for o in task_outputs:
        outs.append(logits_all[:, off:off + o])
        off += o
    return tuple(outs)


def init_params(key, vocab, embedding_dim, n_filters, task_outputs, seq_len):
    """Deterministic synthetic params; fold / pad / cast ONCE here (in f32)."""
    D, F = embedding_dim, n_filters
    O = sum(task_outputs)
    v_pad = _round_up(vocab, 128)
    f_pad = _round_up(F, 128)
    o_pad = _round_up(O, 128)

    k_emb, k_conv, *k_fc = jax.random.split(key, 2 + len(task_outputs))

    # nn.Embedding(input_size, embedding_dim)
    embedding = jax.random.normal(k_emb, (vocab, D), jnp.float32)

    # nn.Conv2d(1, n_filters, (1, embedding_dim), bias=False):
    # PyTorch weight (F, 1, 1, D) -> stored as (D, F).
    conv_w = jax.random.normal(k_conv, (F, 1, 1, D), jnp.float32) * 0.05
    conv_w = jnp.transpose(conv_w.reshape(F, D), (1, 0))

    # nn.BatchNorm2d(n_filters), eval-mode affine fold
    # (gamma=1, beta=0, running_mean=0, running_var=1).
    eps = 1e-5
    gamma = jnp.ones((F,), jnp.float32)
    beta = jnp.zeros((F,), jnp.float32)
    r_mean = jnp.zeros((F,), jnp.float32)
    r_var = jnp.ones((F,), jnp.float32)
    bn_scale = gamma / jnp.sqrt(r_var + eps)
    bn_bias = beta - r_mean * bn_scale
    conv_w_folded = conv_w * bn_scale[None, :]            # (D, F)

    # Fold conv1(+BN scale) into the embedding table, in f32: (vocab, F).
    fused = embedding @ conv_w_folded

    # StaticTaskRouting([nn.Linear(F, s) for s in task_outputs]), concatenated,
    # with the AdaptiveAvgPool2d 1/seq_len folded into the weights.
    ws, bs = [], []
    for kk, o in zip(k_fc, task_outputs):
        kw, kb = jax.random.split(kk)
        ws.append(jax.random.normal(kw, (F, o), jnp.float32) * 0.05)
        bs.append(jax.random.normal(kb, (1, o), jnp.float32) * 0.05)
    fc_w = jnp.concatenate(ws, axis=1) * (1.0 / float(seq_len))
    fc_b = jnp.concatenate(bs, axis=1)

    # Zero-pad to lane width (128); matmul operands -> bf16, biases stay f32.
    fused_p = jnp.zeros((v_pad, f_pad), jnp.float32).at[:vocab, :F].set(fused)
    bi_p = jnp.zeros((1, f_pad), jnp.float32).at[:, :F].set(bn_bias[None, :])
    fw_p = jnp.zeros((f_pad, o_pad), jnp.float32).at[:F, :O].set(fc_w)
    fb_p = jnp.zeros((1, o_pad), jnp.float32).at[:, :O].set(fc_b)

    return {
        "fused_emb_conv": fused_p.astype(jnp.bfloat16),
        "bn_bias": bi_p,          # f32: elementwise path stays f32 (v5e-safe)
        "fc_w": fw_p.astype(jnp.bfloat16),
        "fc_b": fb_p,             # f32
    }


if __name__ == "__main__":
    key = jax.random.PRNGKey(0)
    k_tok, k_par = jax.random.split(key)

    # Small shapes consistent with the forward pass.
    batch, seq_len = 2, 8
    vocab, embedding_dim, n_filters = 100, 32, 64
    task_outputs = (3, 4, 5)

    params = init_params(k_par, vocab, embedding_dim, n_filters, task_outputs,
                         seq_len)

    # The module's forward takes x and does x = x[0]; emulate the same calling
    # convention: pass a tuple whose first element is the (B, S) token ids.
    tokens = jax.random.randint(k_tok, (batch, seq_len), 0, vocab, jnp.int32)
    x = (tokens,)

    outs = kimcnn_pallas_forward(x[0], params, task_outputs)
    outs = jax.block_until_ready(outs)

    assert len(outs) == len(task_outputs)
    for o, t in zip(outs, task_outputs):
        assert o.shape == (batch, t), o.shape
        assert o.dtype == jnp.float32

    print("KERNEL_OK")
</pallas_src>

<mosaic_0001>
module attributes {stable_mosaic.version = 11 : i64} {
  func.func @_kimcnn_kernel(%arg0: i32, %arg1: memref<16x1xi32, #tpu.memory_space<vmem>>, %arg2: memref<128x128xbf16, #tpu.memory_space<vmem>>, %arg3: memref<1x128xf32, #tpu.memory_space<vmem>>, %arg4: memref<128x128xbf16, #tpu.memory_space<vmem>>, %arg5: memref<1x128xf32, #tpu.memory_space<vmem>>, %arg6: memref<2x128xf32, #tpu.memory_space<vmem>>) attributes {dimension_semantics = [#tpu.dimension_semantics<parallel>], iteration_bounds = array<i64: 1>, scalar_prefetch = 0 : i64, scratch_operands = 0 : i64, tpu.core_type = #tpu.core_type<tc>, window_params = [{transform_indices = @transform_0, window_bounds = array<i64: 16, 1>}, {pipeline_mode = #tpu.pipeline_mode<synchronous>, transform_indices = @transform_1, window_bounds = array<i64: 128, 128>}, {pipeline_mode = #tpu.pipeline_mode<synchronous>, transform_indices = @transform_2, window_bounds = array<i64: 1, 128>}, {pipeline_mode = #tpu.pipeline_mode<synchronous>, transform_indices = @transform_3, window_bounds = array<i64: 128, 128>}, {pipeline_mode = #tpu.pipeline_mode<synchronous>, transform_indices = @transform_4, window_bounds = array<i64: 1, 128>}, {transform_indices = @transform_5, window_bounds = array<i64: 2, 128>}]} {
    %c0 = arith.constant 0 : index
    %c0_0 = arith.constant 0 : index
    %0 = vector.load %arg1[%c0, %c0_0] : memref<16x1xi32, #tpu.memory_space<vmem>>, vector<16x1xi32>
    %1 = tpu.iota {dimensions = array<i32: 1>} : vector<1x128xi32>
    %2 = vector.broadcast %1 : vector<1x128xi32> to vector<16x128xi32>
    %3 = vector.broadcast %0 : vector<16x1xi32> to vector<16x128xi32>
    %4 = arith.cmpi eq, %2, %3 : vector<16x128xi32>
    %5 = arith.extui %4 : vector<16x128xi1> to vector<16x128xi32>
    %6 = arith.sitofp %5 : vector<16x128xi32> to vector<16x128xf32>
    %7 = arith.truncf %6 : vector<16x128xf32> to vector<16x128xbf16>
    %c0_1 = arith.constant 0 : index
    %c0_2 = arith.constant 0 : index
    %8 = vector.load %arg2[%c0_1, %c0_2] : memref<128x128xbf16, #tpu.memory_space<vmem>>, vector<128x128xbf16>
    %cst = arith.constant dense<0.000000e+00> : vector<16x128xf32>
    %9 = tpu.matmul %7, %8, %cst {dimension_numbers = #tpu.dot_dimension_numbers<[1], [0], [0], [1], [0, 0, 1, 1], [], []>} : vector<16x128xbf16>, vector<128x128xbf16>, vector<16x128xf32> -> vector<16x128xf32>
    %c0_3 = arith.constant 0 : index
    %c0_4 = arith.constant 0 : index
    %10 = vector.load %arg3[%c0_3, %c0_4] : memref<1x128xf32, #tpu.memory_space<vmem>>, vector<1x128xf32>
    %11 = vector.broadcast %10 : vector<1x128xf32> to vector<16x128xf32>
    %12 = arith.addf %9, %11 : vector<16x128xf32>
    %cst_5 = arith.constant 0.000000e+00 : f32
    %13 = vector.broadcast %cst_5 : f32 to vector<16x128xf32>
    %14 = arith.maximumf %12, %13 : vector<16x128xf32>
    %15 = vector.shape_cast %14 : vector<16x128xf32> to vector<2x8x128xf32>
    %cst_6 = arith.constant dense<0.000000e+00> : vector<2x128xf32>
    %16 = vector.multi_reduction <add>, %15, %cst_6 [1] : vector<2x8x128xf32> to vector<2x128xf32>
    %17 = arith.truncf %16 : vector<2x128xf32> to vector<2x128xbf16>
    %c0_7 = arith.constant 0 : index
    %c0_8 = arith.constant 0 : index
    %18 = vector.load %arg4[%c0_7, %c0_8] : memref<128x128xbf16, #tpu.memory_space<vmem>>, vector<128x128xbf16>
    %cst_9 = arith.constant dense<0.000000e+00> : vector<2x128xf32>
    %19 = tpu.matmul %17, %18, %cst_9 {dimension_numbers = #tpu.dot_dimension_numbers<[1], [0], [0], [1], [0, 0, 1, 1], [], []>} : vector<2x128xbf16>, vector<128x128xbf16>, vector<2x128xf32> -> vector<2x128xf32>
    %c0_10 = arith.constant 0 : index
    %c0_11 = arith.constant 0 : index
    %20 = vector.load %arg5[%c0_10, %c0_11] : memref<1x128xf32, #tpu.memory_space<vmem>>, vector<1x128xf32>
    %21 = vector.broadcast %20 : vector<1x128xf32> to vector<2x128xf32>
    %22 = arith.addf %19, %21 : vector<2x128xf32>
    %c0_12 = arith.constant 0 : index
    %c0_13 = arith.constant 0 : index
    %23 = vector.load %arg6[%c0_12, %c0_13] : memref<2x128xf32, #tpu.memory_space<vmem>>, vector<2x128xf32>
    tpu.vector_store %arg6[%c0_12, %c0_13], %22 {strides = array<i32>} : memref<2x128xf32, #tpu.memory_space<vmem>>, vector<2x128xf32>,
    return
  }
  func.func @transform_0(%arg0: i32) -> (i32, i32) {
    %c0_i32 = arith.constant 0 : i32
    %c0_i32_0 = arith.constant 0 : i32
    return %arg0, %c0_i32 : i32, i32
  }
  func.func @transform_1(%arg0: i32) -> (i32, i32) {
    %c0_i32 = arith.constant 0 : i32
    %c0_i32_0 = arith.constant 0 : i32
    %c0_i32_1 = arith.constant 0 : i32
    return %c0_i32, %c0_i32_0 : i32, i32
  }
  func.func @transform_2(%arg0: i32) -> (i32, i32) {
    %c0_i32 = arith.constant 0 : i32
    %c0_i32_0 = arith.constant 0 : i32
    %c0_i32_1 = arith.constant 0 : i32
    return %c0_i32, %c0_i32_0 : i32, i32
  }
  func.func @transform_3(%arg0: i32) -> (i32, i32) {
    %c0_i32 = arith.constant 0 : i32
    %c0_i32_0 = arith.constant 0 : i32
    %c0_i32_1 = arith.constant 0 : i32
    return %c0_i32, %c0_i32_0 : i32, i32
  }
  func.func @transform_4(%arg0: i32) -> (i32, i32) {
    %c0_i32 = arith.constant 0 : i32
    %c0_i32_0 = arith.constant 0 : i32
    %c0_i32_1 = arith.constant 0 : i32
    return %c0_i32, %c0_i32_0 : i32, i32
  }
  func.func @transform_5(%arg0: i32) -> (i32, i32) {
    %c0_i32 = arith.constant 0 : i32
    %c0_i32_0 = arith.constant 0 : i32
    return %arg0, %c0_i32 : i32, i32
  }
}

</mosaic_0001>

<bundles_post_ra>
// kernel: kimcnn_pallas_forward.1
= control target key start
LH: loop header
LB: loop body
LE: loop exit
PB: predicated region body
PF: predicated region fallthrough
CT: control target
= control target key end

     0   :  { %10 = vsyncpa [#allocation3], 0  ;;  %s528_s0 = inlined_call_operand.vmem [shape: s32[16,1], index: 0, kind: input, shape index: {}]   ;;  %s529_s1 = inlined_call_operand.hbm [shape: bf16[128,128], index: 1, kind: input, shape index: {}]   ;;  %s530_s2 = inlined_call_operand.vmem [shape: f32[1,128], index: 2, kind: input, shape index: {}]   ;;  %s531_s3 = inlined_call_operand.hbm [shape: bf16[128,128], index: 3, kind: input, shape index: {}]   ;;  %s532_s4 = inlined_call_operand.vmem [shape: f32[1,128], index: 4, kind: input, shape index: {}]   ;;  %s533_s5 = inlined_call_operand.vmem [shape: f32[2,128], index: 5, kind: output, shape index: {}]  }
   0x1   :  { %11 = vsyncpa [#allocation5], 0  ;;  %s469_s18 = smov [#allocation2]  }
   0x2   :  { %s19_s19 = sshll.u32 %s469_s18, 4  ;;  %s20_s19 = int_to_ptr.vmem [resolvable:$true] %s19_s19 }
   0x3   :  { %s433_s20 = scalar_lea.vmem %s20_s19, 1024  ;;  %p438_p1 = scmp.lt.s32.totalorder %s20_s19, %s20_s19 }
   0x4   :  { %p434_p0 = scmp.ne.s32.totalorder %s20_s19, %s433_s20  ;;  %p439_p2 = scmp.lt.s32.totalorder %s433_s20, %s433_s20 }
   0x6   :  { %p440_p3 = por %p439_p2, %p438_p1 }
   0x8   :  { %p441_p4 = pnand %p440_p3, %p434_p0 }
   0xa   :  { %444 = shalt.err (!%p441_p4)
}
   0xb   :  { %s470_s21 = smov 64   ;;  %s471_s22 = smov 4  }
   0xc   :  { %25 = dma.hbm_to_vmem [thread:$0]  %s529_s1, 1024, %s20_s19, [#allocation3], %s470_s21, %s470_s21, %s471_s22  }
   0xd   :  { %s472_s25 = smov [#allocation4]  }
   0xe   :  { %s33_s26 = sshll.u32 %s472_s25, 4  ;;  %s34_s26 = int_to_ptr.vmem [resolvable:$true] %s33_s26 }
   0xf   :  { %s453_s27 = scalar_lea.vmem %s34_s26, 1024  ;;  %p458_p6 = scmp.lt.s32.totalorder %s34_s26, %s34_s26 }
  0x10   :  { %p454_p5 = scmp.ne.s32.totalorder %s34_s26, %s453_s27  ;;  %p459_p7 = scmp.lt.s32.totalorder %s453_s27, %s453_s27 }
  0x12   :  { %p460_p8 = por %p459_p7, %p458_p6 }
  0x14   :  { %p461_p9 = pnand %p460_p8, %p454_p5 }
  0x16   :  { %464 = shalt.err (!%p461_p9)
}
  0x17   :  { %39 = dma.hbm_to_vmem [thread:$0]  %s531_s3, 1024, %s34_s26, [#allocation5], %s470_s21, %s470_s21, %s471_s22  }
  0x18   :  { %465 = dma.done.wait [#allocation3], 1024  }
  0x19   :  { %466 = vsyncadd [#allocation3], 4294966272 }
  0x1a   :  { %467 = dma.done.wait [#allocation5], 1024  }
  0x1b   :  { %468 = vsyncadd [#allocation5], 4294966272  ;;  %v473_v0 = vmov 0   ;;  %v474_v1 = vmov 0.0   ;;  %v49_v2 = vld [vmem:[%s528_s0] sm:$0xff]  ;;  %v409_v3 = vld [vmem:[#allocation2 + $0x38] sm:$0xff]   ;;  %v51_v13 = vlaneseq }
  0x1c   :  { %408 = vset.pattern.permute.xlu0 %v473_v0  ;;  %360 = vmatprep.subr.bf16.mxu0 %v474_v1  ;;  %v50_v4 = vld [vmem:[%s528_s0 + $0x8] sm:$0xff]  ;;  %vm475_vm0 = vmmov 0   ;;  %v410_v5 = vld [vmem:[#allocation2 + $0x30] sm:$0xff]   ;;  %v417_v7 = vld [vmem:[#allocation4 + $0x38] sm:$0xff]   ;;  %v476_v17 = vmov 1.0|1.0  }
  0x1d   :  { %380 = vmatprep.subr.bf16.mxu1 %v474_v1  ;;  %54 = vperm.xlu0 %408, %v49_v2   ;;  %v411_v6 = vld [vmem:[#allocation2 + $0x28] sm:$0xff]   ;;  %v412_v8 = vld [vmem:[#allocation2 + $0x20] sm:$0xff]   ;;  %v413_v9 = vld [vmem:[#allocation2 + $0x18] sm:$0xff]   ;;  %v52_v15 = vand.u32 127, %v51_v13  ;;  %vm221_vm4 = vcmask 1041409  }
  0x1e   :  { %376 = vmatprep.mubr.msk.bf16.mxu0 %vm475_vm0, %v474_v1  ;;  %396 = vmatprep.mubr.msk.bf16.mxu1 %vm475_vm0, %v474_v1  ;;  %v414_v10 = vld [vmem:[#allocation2 + $0x10] sm:$0xff]   ;;  %v415_v11 = vld [vmem:[#allocation2 + $0x8] sm:$0xff]   ;;  %v416_v12 = vld [vmem:[#allocation2] sm:$0xff]  }
  0x1f   :  { %361 = vmatpush3.bf16.msra.mxu0 %v409_v3  ;;  %381 = vmatpush3.bf16.msra.mxu1 %v417_v7  ;;  %v418_v18 = vld [vmem:[#allocation4 + $0x30] sm:$0xff]   ;;  %v419_v19 = vld [vmem:[#allocation4 + $0x28] sm:$0xff]   ;;  %v420_v20 = vld [vmem:[#allocation4 + $0x20] sm:$0xff]  }
  0x20   :  { %362 = vmatprep.subr.bf16.mxu0 %v474_v1  ;;  %382 = vmatprep.subr.bf16.mxu1 %v474_v1  ;;  %v421_v21 = vld [vmem:[#allocation4 + $0x18] sm:$0xff]   ;;  %v422_v22 = vld [vmem:[#allocation4 + $0x10] sm:$0xff]   ;;  %v423_v23 = vld [vmem:[#allocation4 + $0x8] sm:$0xff]  }
  0x21   :  { %57 = vperm.xlu0 %408, %v50_v4   ;;  %v424_v24 = vld [vmem:[#allocation4] sm:$0xff]  }
  0x22   :  { %v322_v25 = vld [vmem:[%s530_s2] ss:$0 sm:$0xff] }
  0x23   :  { %363 = vmatpush3.bf16.msra.mxu0 %v410_v5  ;;  %383 = vmatpush3.bf16.msra.mxu1 %v418_v18  ;;  %v333_v52 = vld [vmem:[%s532_s4] ss:$0 sm:$0xff] }
  0x24   :  { %364 = vmatprep.subr.bf16.mxu0 %v474_v1  ;;  %384 = vmatprep.subr.bf16.mxu1 %v474_v1 }
  0x27   :  { %365 = vmatpush3.bf16.msra.mxu0 %v411_v6  ;;  %385 = vmatpush3.bf16.msra.mxu1 %v419_v19 }
  0x28   :  { %366 = vmatprep.subr.bf16.mxu0 %v474_v1  ;;  %386 = vmatprep.subr.bf16.mxu1 %v474_v1 }
  0x2b   :  { %367 = vmatpush3.bf16.msra.mxu0 %v412_v8  ;;  %387 = vmatpush3.bf16.msra.mxu1 %v420_v20 }
  0x2c   :  { %368 = vmatprep.subr.bf16.mxu0 %v474_v1  ;;  %388 = vmatprep.subr.bf16.mxu1 %v474_v1 }
  0x2f   :  { %369 = vmatpush3.bf16.msra.mxu0 %v413_v9  ;;  %389 = vmatpush3.bf16.msra.mxu1 %v421_v21 }
  0x30   :  { %370 = vmatprep.subr.bf16.mxu0 %v474_v1  ;;  %390 = vmatprep.subr.bf16.mxu1 %v474_v1 }
  0x33   :  { %371 = vmatpush3.bf16.msra.mxu0 %v414_v10  ;;  %391 = vmatpush3.bf16.msra.mxu1 %v422_v22 }
  0x34   :  { %372 = vmatprep.subr.bf16.mxu0 %v474_v1  ;;  %392 = vmatprep.subr.bf16.mxu1 %v474_v1 }
  0x37   :  { %373 = vmatpush3.bf16.msra.mxu0 %v415_v11  ;;  %393 = vmatpush3.bf16.msra.mxu1 %v423_v23 }
  0x38   :  { %374 = vmatprep.subr.bf16.mxu0 %v474_v1  ;;  %394 = vmatprep.subr.bf16.mxu1 %v474_v1 }
  0x3b   :  { %375 = vmatpush3.bf16.msra.mxu0 %v416_v12  ;;  %395 = vmatpush3.bf16.msra.mxu1 %v424_v24 }
  0x98   :  { %v55_v14 = vpop.permute.xlu0 %54 }
  0x99   :  { %vm59_vm1 = vcmp.eq.s32.totalorder %v52_v15, %v55_v14 }
  0x9c   :  { %v58_v16 = vpop.permute.xlu0 %57 }
  0x9d   :  { %vm60_vm2 = vcmp.eq.s32.totalorder %v52_v15, %v58_v16 }
  0x9e   :  { %vm331_vm3 = vmpackc.low %vm60_vm2, %vm59_vm1 }
  0x9f   :  { %377 = vmatmul.mubr.msk.bf16.vlgmr.msra.gmra.mxu0 %vm331_vm3, %v476_v17 }
 0x15f   :  { %v171_v26 = vpop.f32.mrf.mxu0 }
 0x160   :  { %v172_v27 = vadd.f32 %v322_v25, %v171_v26 }
 0x161   :  { %v378_v28 = vpop.f32.mrf.mxu0 }
 0x162   :  { %v178_v29 = vmax.f32 %v172_v27, 0.0 }
 0x163   :  { %v174_v30 = vpop.f32.mrf.mxu0 }
 0x164   :  { %v180_v31 = vrot.slane %v178_v29, 4  ;;  %v175_v32 = vadd.f32 %v322_v25, %v174_v30 }
 0x165   :  { %v379_v33 = vpop.f32.mrf.mxu0 }
 0x166   :  { %v181_v34 = vadd.f32 %v180_v31, %v178_v29  ;;  %v179_v35 = vmax.f32 %v175_v32, 0.0 }
 0x168   :  { %v182_v36 = vrot.slane %v181_v34, 2  ;;  %v186_v37 = vrot.slane %v179_v35, 4 }
 0x16a   :  { %v183_v38 = vadd.f32 %v182_v36, %v181_v34  ;;  %v187_v39 = vadd.f32 %v186_v37, %v179_v35 }
 0x16c   :  { %v184_v40 = vrot.slane %v183_v38, 1  ;;  %v188_v41 = vrot.slane %v187_v39, 2 }
 0x16e   :  { %v185_v42 = vadd.f32 %v184_v40, %v183_v38  ;;  %v189_v43 = vadd.f32 %v188_v41, %v187_v39 }
 0x170   :  { %v190_v44 = vrot.slane %v189_v43, 1  ;;  %v192_v45 = vpack.c.bf16 %v185_v42, %v185_v42 }
 0x172   :  { %v191_v46 = vadd.f32 %v190_v44, %v189_v43  ;;  %v219_v48 = vunpack.c.l.b16 %v192_v45 }
 0x174   :  { %v193_v47 = vpack.c.bf16 %v191_v46, %v191_v46 }
 0x176   :  { %v220_v49 = vunpack.c.l.b16 %v193_v47 }
 0x178   :  { %v222_v50 = vsel %vm221_vm4, %v220_v49, %v219_v48 }
 0x179   :  { %v223_v51 = vpack.c.b16 %v222_v50, %v222_v50 }
 0x17b   :  { %397 = vmatmul.mubr.bf16.vlgmr.msra.gmra.mxu1 %v223_v51 }
 0x23b   :  { %v307_v53 = vpop.f32.mrf.mxu1 }
 0x23c   :  { %v308_v54 = vadd.f32 %v333_v52, %v307_v53 }
 0x23d   :  { %v398_v55 = vpop.f32.mrf.mxu1 }
 0x23e   :  { %313 = vst [vmem:[%s533_s5] sm:$0x3] %v308_v54 }
 0x23f   :  { %v310_v56 = vpop.f32.mrf.mxu1 }
 0x241   :  { %v399_v57 = vpop.f32.mrf.mxu1 }
 0x242   :  { %318 = vsyncpa [#allocation3], 1 }
 0x243   :  { %319 = vsyncpa [#allocation5], 1 }

</bundles_post_ra>
